<compile_context>
chip_gen: v5e
topology: v5e:2x2
jax: 0.10.0
libtpu: 0.0.40
codegen_flags: <defaults>
</compile_context>

<pallas_src>
import functools
import math

import jax
import jax.numpy as jnp
from jax import lax
from jax.experimental import pallas as pl
from jax.experimental.pallas import tpu as pltpu

LN_EPS = 1e-12                     # Google-BERT layernorm epsilon
VMEM_LIMIT = 32 * 1024 * 1024      # modest request; kernels only need a few MiB


# ----------------------------- in-kernel helpers -----------------------------

def _layer_norm(x, gamma, beta):
    mu = jnp.mean(x, axis=-1, keepdims=True)
    var = jnp.mean((x - mu) ** 2, axis=-1, keepdims=True)
    return (x - mu) * jax.lax.rsqrt(var + LN_EPS) * gamma + beta


def _gelu(x):
    # BERT gelu (tanh approximation) -> EUP tanh, f32 VPU math.
    return 0.5 * x * (1.0 + jnp.tanh(0.7978845608028654 * (x + 0.044715 * x * x * x)))


def _pick_tile(dim, target, align):
    """Largest multiple of `align` that divides `dim` and is <= target (else full dim)."""
    # TODO(synk): for shapes not divisible by `align` this falls back to the full
    # dimension (could blow VMEM for awkward shapes); pad/mask edge tiles instead.
    if dim % align != 0:
        return dim
    t = min(target, dim)
    t -= t % align
    while t >= align:
        if dim % t == 0:
            return t
        t -= align
    return dim


# -------------------------------- kernels ------------------------------------

def dense_kernel(activation, x_ref, w_ref, b_ref, o_ref, acc_ref):
    """Tiled y = act(x @ W + b); f32 accumulate, bf16 MXU inputs."""
    k = pl.program_id(2)

    @pl.when(k == 0)
    def _():
        acc_ref[...] = jnp.zeros_like(acc_ref)

    acc_ref[...] += jnp.dot(x_ref[...], w_ref[...],
                            preferred_element_type=jnp.float32)

    @pl.when(k == pl.num_programs(2) - 1)
    def _():
        y = acc_ref[...] + b_ref[...]
        if activation == "gelu":
            y = _gelu(y)
        o_ref[...] = y.astype(o_ref.dtype)


def dense_res_ln_kernel(x_ref, w_ref, b_ref, res_ref, g_ref, beta_ref,
                        o_ref, acc_ref):
    """Tiled y = LayerNorm(x @ W + b + residual); full N per block (LN over H)."""
    k = pl.program_id(1)

    @pl.when(k == 0)
    def _():
        acc_ref[...] = jnp.zeros_like(acc_ref)

    acc_ref[...] += jnp.dot(x_ref[...], w_ref[...],
                            preferred_element_type=jnp.float32)

    @pl.when(k == pl.num_programs(1) - 1)
    def _():
        y = acc_ref[...] + b_ref[...] + res_ref[...].astype(jnp.float32)
        o_ref[...] = _layer_norm(y, g_ref[...], beta_ref[...]).astype(o_ref.dtype)


def attention_kernel(num_heads, head_dim, bias_ref, qkv_q_ref, qkv_kv_ref, o_ref):
    """One (batch, q-tile) attention block.

    qkv_q_ref : (1, tq, 3H) bf16   -- Q rows of the fused QKV tensor
    qkv_kv_ref: (1, S,  3H) bf16   -- full-S view (K and V slices used)
    bias_ref  : (1, S)      f32    -- additive mask bias for this batch
    o_ref     : (1, tq, H)  bf16   -- lane-dense output (head-merge is a free reshape)

    1/sqrt(head_dim) is pre-folded into the Q projection weights.
    """
    H = num_heads * head_dim
    bias = bias_ref[...]                                  # (1, S) f32
    xq = qkv_q_ref[0]                                     # (tq, 3H) bf16
    xkv = qkv_kv_ref[0]                                   # (S,  3H) bf16

    # TODO(synk): attention-probs dropout omitted (inference semantics, identity).
    # TODO(synk): for S >= 1024 add a KV-tile grid axis with online-softmax
    #             (m/l/acc scratch) instead of the full (tq, S) score tile.
    ctx_parts = []
    for h in range(num_heads):                            # static unroll over heads
        qh = xq[:, h * head_dim:(h + 1) * head_dim]                   # (tq, hd)
        kh = xkv[:, H + h * head_dim:H + (h + 1) * head_dim]          # (S,  hd)
        vh = xkv[:, 2 * H + h * head_dim:2 * H + (h + 1) * head_dim]  # (S,  hd)
        # contraction ((1,),(1,)) -> no relayout of the resident K tile
        s = lax.dot_general(qh, kh, (((1,), (1,)), ((), ())),
                            preferred_element_type=jnp.float32)       # (tq, S)
        s = s + bias
        p = jax.nn.softmax(s, axis=-1)
        ctx_h = jnp.dot(p.astype(vh.dtype), vh,
                        preferred_element_type=jnp.float32)           # (tq, hd)
        ctx_parts.append(ctx_h.astype(o_ref.dtype))
    o_ref[0] = jnp.concatenate(ctx_parts, axis=-1)        # single lane-dense store


def embedding_ln_kernel(we_ref, te_ref, pe_ref, g_ref, b_ref, o_ref):
    """word_emb + token_type_emb + position_emb, then LayerNorm (per batch row)."""
    # TODO(synk): hidden dropout omitted (inference semantics, identity).
    x = (we_ref[0].astype(jnp.float32)
         + te_ref[0].astype(jnp.float32)
         + pe_ref[...].astype(jnp.float32))
    o_ref[0] = _layer_norm(x, g_ref[...], b_ref[...]).astype(o_ref.dtype)


# ------------------------------ pallas wrappers -------------------------------

def dense(x, w, b, activation=None, out_dtype=jnp.bfloat16,
          tm_target=256, tn_target=512, tk_target=512):
    M, K = x.shape
    N = w.shape[1]
    tm = _pick_tile(M, tm_target, 16)    # bf16 sublane packing: 16 rows / vreg
    tn = _pick_tile(N, tn_target, 128)
    tk = _pick_tile(K, tk_target, 128)
    # TODO(synk): sweep pipeline_mode=pl.Buffered(3) on the weight stream for
    # v7x latency-bound cases.
    return pl.pallas_call(
        functools.partial(dense_kernel, activation),
        out_shape=jax.ShapeDtypeStruct((M, N), out_dtype),
        grid=(M // tm, N // tn, K // tk),
        in_specs=[
            pl.BlockSpec((tm, tk), lambda i, j, k: (i, k)),
            pl.BlockSpec((tk, tn), lambda i, j, k: (k, j)),
            pl.BlockSpec((1, tn), lambda i, j, k: (0, j)),
        ],
        out_specs=pl.BlockSpec((tm, tn), lambda i, j, k: (i, j)),
        scratch_shapes=[pltpu.VMEM((tm, tn), jnp.float32)],
        compiler_params=pltpu.CompilerParams(
            dimension_semantics=("parallel", "parallel", "arbitrary"),
            vmem_limit_bytes=VMEM_LIMIT),
    )(x, w, b.reshape(1, N).astype(jnp.float32))


def dense_residual_ln(x, w, b, residual, gamma, beta, out_dtype=jnp.bfloat16,
                      tm_target=256, tk_target=512):
    M, K = x.shape
    N = w.shape[1]
    tm = _pick_tile(M, tm_target, 16)
    tk = _pick_tile(K, tk_target, 128)
    return pl.pallas_call(
        dense_res_ln_kernel,
        out_shape=jax.ShapeDtypeStruct((M, N), out_dtype),
        grid=(M // tm, K // tk),
        in_specs=[
            pl.BlockSpec((tm, tk), lambda i, k: (i, k)),
            pl.BlockSpec((tk, N), lambda i, k: (k, 0)),
            pl.BlockSpec((1, N), lambda i, k: (0, 0)),
            pl.BlockSpec((tm, N), lambda i, k: (i, 0)),
            pl.BlockSpec((1, N), lambda i, k: (0, 0)),
            pl.BlockSpec((1, N), lambda i, k: (0, 0)),
        ],
        out_specs=pl.BlockSpec((tm, N), lambda i, k: (i, 0)),
        scratch_shapes=[pltpu.VMEM((tm, N), jnp.float32)],
        compiler_params=pltpu.CompilerParams(
            dimension_semantics=("parallel", "arbitrary"),
            vmem_limit_bytes=VMEM_LIMIT),
    )(x, w, b.reshape(1, N).astype(jnp.float32), residual,
      gamma.reshape(1, N).astype(jnp.float32),
      beta.reshape(1, N).astype(jnp.float32))


def attention(qkv, mask_bias, num_heads, tq_target=128):
    """qkv: (B, S, 3H) fused QKV; mask_bias: (B, S) f32; returns (B, S, H)."""
    B, S, H3 = qkv.shape
    H = H3 // 3
    hd = H // num_heads
    assert hd * num_heads == H
    tq = _pick_tile(S, tq_target, 16)
    return pl.pallas_call(
        functools.partial(attention_kernel, num_heads, hd),
        out_shape=jax.ShapeDtypeStruct((B, S, H), qkv.dtype),
        grid=(B, S // tq),
        in_specs=[
            pl.BlockSpec((1, S), lambda b, qi: (b, 0)),         # per-batch mask bias
            pl.BlockSpec((1, tq, H3), lambda b, qi: (b, qi, 0)),  # Q rows (fused QKV)
            pl.BlockSpec((1, S, H3), lambda b, qi: (b, 0, 0)),    # full-S K/V view
        ],
        out_specs=pl.BlockSpec((1, tq, H), lambda b, qi: (b, qi, 0)),
        compiler_params=pltpu.CompilerParams(
            dimension_semantics=("parallel", "parallel"),
            vmem_limit_bytes=VMEM_LIMIT),
    )(mask_bias, qkv, qkv)


def embeddings_forward(params, input_ids, token_type_ids):
    B, S = input_ids.shape
    H = params["word_emb"].shape[-1]
    assert S <= params["pos_emb"].shape[0]
    # Embedding gathers stay in plain JAX glue (data-dependent gather);
    # tables are stored bf16 so the three (B,S,H) streams are half-width.
    we = jnp.take(params["word_emb"], input_ids, axis=0)           # (B,S,H) bf16
    te = jnp.take(params["tok_type_emb"], token_type_ids, axis=0)  # (B,S,H) bf16
    pe = params["pos_emb"][:S]                                     # (S,H)   bf16
    return pl.pallas_call(
        embedding_ln_kernel,
        out_shape=jax.ShapeDtypeStruct((B, S, H), jnp.bfloat16),
        grid=(B,),
        in_specs=[
            pl.BlockSpec((1, S, H), lambda b: (b, 0, 0)),
            pl.BlockSpec((1, S, H), lambda b: (b, 0, 0)),
            pl.BlockSpec((S, H), lambda b: (0, 0)),
            pl.BlockSpec((1, H), lambda b: (0, 0)),
            pl.BlockSpec((1, H), lambda b: (0, 0)),
        ],
        out_specs=pl.BlockSpec((1, S, H), lambda b: (b, 0, 0)),
        compiler_params=pltpu.CompilerParams(
            dimension_semantics=("parallel",),
            vmem_limit_bytes=VMEM_LIMIT),
    )(we, te, pe,
      params["emb_ln_g"].reshape(1, H), params["emb_ln_b"].reshape(1, H))


def encoder_layer_forward(lp, hidden2d, mask_bias, B, S, num_heads):
    H = hidden2d.shape[-1]

    # Fused Q/K/V projection: one matmul over the activation, N = 3H.
    qkv = dense(hidden2d, lp["w_qkv"], lp["b_qkv"])                  # (B*S, 3H) bf16
    ctx = attention(qkv.reshape(B, S, 3 * H), mask_bias, num_heads)  # (B, S, H)
    ctx2d = ctx.reshape(B * S, H)                                    # free reshape

    h1 = dense_residual_ln(ctx2d, lp["wo"], lp["bo"], hidden2d,
                           lp["ln1_g"], lp["ln1_b"])
    inter = dense(h1, lp["wi"], lp["bi"], activation="gelu")
    h2 = dense_residual_ln(inter, lp["wo2"], lp["bo2"], h1,
                           lp["ln2_g"], lp["ln2_b"])
    return h2


def bert_forward(params, cfg, input_ids, input_mask=None, token_type_ids=None):
    """`params` must be the output of prepare_params()."""
    assert input_ids.ndim == 2
    B, S = input_ids.shape
    H = cfg["hidden_size"]
    nh = cfg["num_attention_heads"]
    if input_mask is None:
        input_mask = jnp.ones((B, S), dtype=jnp.int32)
    if token_type_ids is None:
        token_type_ids = jnp.zeros((B, S), dtype=jnp.int32)

    # create_attention_mask_from_input_mask: mask[b, i, j] = input_mask[b, j]
    # -> only a (B, S) additive bias is needed; never materialize (B, S, S).
    mask_bias = (1.0 - input_mask.astype(jnp.float32)) * -10000.0  # (B, S)

    hidden = embeddings_forward(params, input_ids, token_type_ids)  # (B,S,H) bf16
    hidden2d = hidden.reshape(B * S, H)

    # TODO(synk): cross-layer weight prefetch (P10 cross-call DMA future) not
    # implemented; each layer relies on in-kernel BlockSpec pipelining instead.
    all_encoder_layers = []
    for lp in params["layers"]:
        hidden2d = encoder_layer_forward(lp, hidden2d, mask_bias, B, S, nh)
        all_encoder_layers.append(hidden2d.reshape(B, S, H))
    return all_encoder_layers


# ------------------------------ parameter prep ---------------------------------

def init_params(key, cfg):
    H = cfg["hidden_size"]
    I = cfg["intermediate_size"]
    std = cfg["initializer_range"]

    def nrm(k, shape, dtype=jnp.float32):
        return (std * jax.random.normal(k, shape, jnp.float32)).astype(dtype)

    keys = iter(jax.random.split(key, 8 + 8 * cfg["num_hidden_layers"]))
    params = {
        "word_emb": nrm(next(keys), (cfg["vocab_size"], H)),
        "tok_type_emb": nrm(next(keys), (cfg["type_vocab_size"], H)),
        "pos_emb": nrm(next(keys), (cfg["max_position_embeddings"], H)),
        "emb_ln_g": jnp.ones((H,), jnp.float32),
        "emb_ln_b": jnp.zeros((H,), jnp.float32),
        "layers": [],
    }
    wdt = jnp.bfloat16  # MXU weights stored bf16; biases / LN params stay f32
    for _ in range(cfg["num_hidden_layers"]):
        lp = {
            "wq": nrm(next(keys), (H, H), wdt), "bq": jnp.zeros((H,), jnp.float32),
            "wk": nrm(next(keys), (H, H), wdt), "bk": jnp.zeros((H,), jnp.float32),
            "wv": nrm(next(keys), (H, H), wdt), "bv": jnp.zeros((H,), jnp.float32),
            "wo": nrm(next(keys), (H, H), wdt), "bo": jnp.zeros((H,), jnp.float32),
            "ln1_g": jnp.ones((H,), jnp.float32),
            "ln1_b": jnp.zeros((H,), jnp.float32),
            "wi": nrm(next(keys), (H, I), wdt), "bi": jnp.zeros((I,), jnp.float32),
            "wo2": nrm(next(keys), (I, H), wdt), "bo2": jnp.zeros((H,), jnp.float32),
            "ln2_g": jnp.ones((H,), jnp.float32),
            "ln2_b": jnp.zeros((H,), jnp.float32),
        }
        params["layers"].append(lp)
    return params


def prepare_params(params, cfg):
    """One-time prep: fold 1/sqrt(head_dim) into wq/bq, build fused [wq|wk|wv],
    and cast the embedding tables to bf16."""
    H = cfg["hidden_size"]
    nh = cfg["num_attention_heads"]
    hd = H // nh
    scale = 1.0 / math.sqrt(hd)

    prepared = {
        "word_emb": params["word_emb"].astype(jnp.bfloat16),
        "tok_type_emb": params["tok_type_emb"].astype(jnp.bfloat16),
        "pos_emb": params["pos_emb"].astype(jnp.bfloat16),
        "emb_ln_g": params["emb_ln_g"].astype(jnp.float32),
        "emb_ln_b": params["emb_ln_b"].astype(jnp.float32),
        "layers": [],
    }
    for lp in params["layers"]:
        wq = (lp["wq"].astype(jnp.float32) * scale).astype(lp["wq"].dtype)
        bq = lp["bq"].astype(jnp.float32) * scale
        w_qkv = jnp.concatenate([wq, lp["wk"], lp["wv"]], axis=1)   # (H, 3H)
        b_qkv = jnp.concatenate(
            [bq, lp["bk"].astype(jnp.float32), lp["bv"].astype(jnp.float32)])
        prepared["layers"].append({
            "w_qkv": w_qkv, "b_qkv": b_qkv,
            "wo": lp["wo"], "bo": lp["bo"],
            "ln1_g": lp["ln1_g"], "ln1_b": lp["ln1_b"],
            "wi": lp["wi"], "bi": lp["bi"],
            "wo2": lp["wo2"], "bo2": lp["bo2"],
            "ln2_g": lp["ln2_g"], "ln2_b": lp["ln2_b"],
        })
    return prepared


# ----------------------------------- main --------------------------------------

if __name__ == "__main__":
    cfg = dict(
        vocab_size=64,
        hidden_size=128,
        num_hidden_layers=2,
        num_attention_heads=2,
        intermediate_size=256,
        type_vocab_size=2,
        max_position_embeddings=16,
        initializer_range=0.02,
    )
    B, S = 2, 8

    root = jax.random.PRNGKey(0)
    raw_params = init_params(jax.random.fold_in(root, 0), cfg)
    params = prepare_params(raw_params, cfg)

    input_ids = jax.random.randint(
        jax.random.fold_in(root, 1), (B, S), 0, cfg["vocab_size"], dtype=jnp.int32)
    token_type_ids = jnp.zeros((B, S), dtype=jnp.int32)
    input_mask = jnp.ones((B, S), dtype=jnp.int32)

    all_layers = bert_forward(params, cfg, input_ids, input_mask, token_type_ids)
    jax.block_until_ready(all_layers)

    assert len(all_layers) == cfg["num_hidden_layers"]
    assert all(o.shape == (B, S, cfg["hidden_size"]) for o in all_layers)
    assert all(bool(jnp.all(jnp.isfinite(o.astype(jnp.float32)))) for o in all_layers)
    print("KERNEL_OK")
</pallas_src>

<mosaic_0001>
module attributes {stable_mosaic.version = 11 : i64} {
  func.func @embedding_ln_kernel(%arg0: i32, %arg1: memref<1x8x128xbf16, #tpu.memory_space<vmem>>, %arg2: memref<1x8x128xbf16, #tpu.memory_space<vmem>>, %arg3: memref<8x128xbf16, #tpu.memory_space<vmem>>, %arg4: memref<1x128xf32, #tpu.memory_space<vmem>>, %arg5: memref<1x128xf32, #tpu.memory_space<vmem>>, %arg6: memref<1x8x128xbf16, #tpu.memory_space<vmem>>) attributes {dimension_semantics = [#tpu.dimension_semantics<parallel>], iteration_bounds = array<i64: 2>, scalar_prefetch = 0 : i64, scratch_operands = 0 : i64, tpu.core_type = #tpu.core_type<tc>, window_params = [{transform_indices = @transform_0, window_bounds = array<i64: 1, 8, 128>}, {transform_indices = @transform_1, window_bounds = array<i64: 1, 8, 128>}, {pipeline_mode = #tpu.pipeline_mode<synchronous>, transform_indices = @transform_2, window_bounds = array<i64: 8, 128>}, {pipeline_mode = #tpu.pipeline_mode<synchronous>, transform_indices = @transform_3, window_bounds = array<i64: 1, 128>}, {pipeline_mode = #tpu.pipeline_mode<synchronous>, transform_indices = @transform_4, window_bounds = array<i64: 1, 128>}, {transform_indices = @transform_5, window_bounds = array<i64: 1, 8, 128>}]} {
    %c0 = arith.constant 0 : index
    %c0_0 = arith.constant 0 : index
    %c0_1 = arith.constant 0 : index
    %0 = vector.load %arg1[%c0, %c0_0, %c0_1] : memref<1x8x128xbf16, #tpu.memory_space<vmem>>, vector<1x8x128xbf16>
    %1 = vector.shape_cast %0 : vector<1x8x128xbf16> to vector<8x128xbf16>
    %2 = arith.extf %1 : vector<8x128xbf16> to vector<8x128xf32>
    %c0_2 = arith.constant 0 : index
    %c0_3 = arith.constant 0 : index
    %c0_4 = arith.constant 0 : index
    %3 = vector.load %arg2[%c0_2, %c0_3, %c0_4] : memref<1x8x128xbf16, #tpu.memory_space<vmem>>, vector<1x8x128xbf16>
    %4 = vector.shape_cast %3 : vector<1x8x128xbf16> to vector<8x128xbf16>
    %5 = arith.extf %4 : vector<8x128xbf16> to vector<8x128xf32>
    %6 = arith.addf %2, %5 : vector<8x128xf32>
    %c0_5 = arith.constant 0 : index
    %c0_6 = arith.constant 0 : index
    %7 = vector.load %arg3[%c0_5, %c0_6] : memref<8x128xbf16, #tpu.memory_space<vmem>>, vector<8x128xbf16>
    %8 = arith.extf %7 : vector<8x128xbf16> to vector<8x128xf32>
    %9 = arith.addf %6, %8 : vector<8x128xf32>
    %c0_7 = arith.constant 0 : index
    %c0_8 = arith.constant 0 : index
    %10 = vector.load %arg4[%c0_7, %c0_8] : memref<1x128xf32, #tpu.memory_space<vmem>>, vector<1x128xf32>
    %c0_9 = arith.constant 0 : index
    %c0_10 = arith.constant 0 : index
    %11 = vector.load %arg5[%c0_9, %c0_10] : memref<1x128xf32, #tpu.memory_space<vmem>>, vector<1x128xf32>
    %cst = arith.constant dense<0.000000e+00> : vector<8xf32>
    %12 = vector.multi_reduction <add>, %9, %cst [1] : vector<8x128xf32> to vector<8xf32>
    %13 = vector.shape_cast %12 : vector<8xf32> to vector<8x1xf32>
    %cst_11 = arith.constant 1.280000e+02 : f32
    %14 = vector.broadcast %cst_11 : f32 to vector<8x1xf32>
    %15 = arith.divf %13, %14 : vector<8x1xf32>
    %16 = vector.broadcast %15 : vector<8x1xf32> to vector<8x128xf32>
    %17 = arith.subf %9, %16 : vector<8x128xf32>
    %18 = arith.mulf %17, %17 : vector<8x128xf32>
    %cst_12 = arith.constant dense<0.000000e+00> : vector<8xf32>
    %19 = vector.multi_reduction <add>, %18, %cst_12 [1] : vector<8x128xf32> to vector<8xf32>
    %20 = vector.shape_cast %19 : vector<8xf32> to vector<8x1xf32>
    %cst_13 = arith.constant 1.280000e+02 : f32
    %21 = vector.broadcast %cst_13 : f32 to vector<8x1xf32>
    %22 = arith.divf %20, %21 : vector<8x1xf32>
    %23 = vector.broadcast %15 : vector<8x1xf32> to vector<8x128xf32>
    %24 = arith.subf %9, %23 : vector<8x128xf32>
    %cst_14 = arith.constant 9.99999996E-13 : f32
    %25 = vector.broadcast %cst_14 : f32 to vector<8x1xf32>
    %26 = arith.addf %22, %25 : vector<8x1xf32>
    %27 = math.rsqrt %26 : vector<8x1xf32>
    %28 = vector.broadcast %27 : vector<8x1xf32> to vector<8x128xf32>
    %29 = arith.mulf %24, %28 : vector<8x128xf32>
    %30 = vector.broadcast %10 : vector<1x128xf32> to vector<8x128xf32>
    %31 = arith.mulf %29, %30 : vector<8x128xf32>
    %32 = vector.broadcast %11 : vector<1x128xf32> to vector<8x128xf32>
    %33 = arith.addf %31, %32 : vector<8x128xf32>
    %34 = arith.truncf %33 : vector<8x128xf32> to vector<8x128xbf16>
    %c0_15 = arith.constant 0 : index
    %c0_16 = arith.constant 0 : index
    %c0_17 = arith.constant 0 : index
    %35 = vector.load %arg6[%c0_15, %c0_16, %c0_17] : memref<1x8x128xbf16, #tpu.memory_space<vmem>>, vector<1x8x128xbf16>
    %36 = vector.shape_cast %35 : vector<1x8x128xbf16> to vector<8x128xbf16>
    %37 = vector.shape_cast %34 : vector<8x128xbf16> to vector<1x8x128xbf16>
    tpu.vector_store %arg6[%c0_15, %c0_16, %c0_17], %37 {strides = array<i32>} : memref<1x8x128xbf16, #tpu.memory_space<vmem>>, vector<1x8x128xbf16>,
    return
  }
  func.func @transform_0(%arg0: i32) -> (i32, i32, i32) {
    %c0_i32 = arith.constant 0 : i32
    %c0_i32_0 = arith.constant 0 : i32
    %c0_i32_1 = arith.constant 0 : i32
    return %arg0, %c0_i32, %c0_i32_0 : i32, i32, i32
  }
  func.func @transform_1(%arg0: i32) -> (i32, i32, i32) {
    %c0_i32 = arith.constant 0 : i32
    %c0_i32_0 = arith.constant 0 : i32
    %c0_i32_1 = arith.constant 0 : i32
    return %arg0, %c0_i32, %c0_i32_0 : i32, i32, i32
  }
  func.func @transform_2(%arg0: i32) -> (i32, i32) {
    %c0_i32 = arith.constant 0 : i32
    %c0_i32_0 = arith.constant 0 : i32
    %c0_i32_1 = arith.constant 0 : i32
    return %c0_i32, %c0_i32_0 : i32, i32
  }
  func.func @transform_3(%arg0: i32) -> (i32, i32) {
    %c0_i32 = arith.constant 0 : i32
    %c0_i32_0 = arith.constant 0 : i32
    %c0_i32_1 = arith.constant 0 : i32
    return %c0_i32, %c0_i32_0 : i32, i32
  }
  func.func @transform_4(%arg0: i32) -> (i32, i32) {
    %c0_i32 = arith.constant 0 : i32
    %c0_i32_0 = arith.constant 0 : i32
    %c0_i32_1 = arith.constant 0 : i32
    return %c0_i32, %c0_i32_0 : i32, i32
  }
  func.func @transform_5(%arg0: i32) -> (i32, i32, i32) {
    %c0_i32 = arith.constant 0 : i32
    %c0_i32_0 = arith.constant 0 : i32
    %c0_i32_1 = arith.constant 0 : i32
    return %arg0, %c0_i32, %c0_i32_0 : i32, i32, i32
  }
}

</mosaic_0001>

<bundles_post_ra>
// kernel: tpu_custom_call.1
= control target key start
LH: loop header
LB: loop body
LE: loop exit
PB: predicated region body
PF: predicated region fallthrough
CT: control target
= control target key end

     0   :  { %s918_s0 = inlined_call_operand.hbm [shape: bf16[2,8,128], index: 0, kind: input, shape index: {}]   ;;  %s919_s1 = inlined_call_operand.hbm [shape: bf16[2,8,128], index: 1, kind: input, shape index: {}]   ;;  %s920_s2 = inlined_call_operand.hbm [shape: bf16[8,128], index: 2, kind: input, shape index: {}]   ;;  %s921_s3 = inlined_call_operand.vmem [shape: f32[1,128], index: 3, kind: input, shape index: {}]   ;;  %s922_s4 = inlined_call_operand.vmem [shape: f32[1,128], index: 4, kind: input, shape index: {}]   ;;  %s923_s5 = inlined_call_operand.hbm [shape: bf16[2,8,128], index: 5, kind: output, shape index: {}]  }
   0x1   :  { %927 = sst [smem:[#allocation16_spill]] %s920_s2 }
   0x2   :  { %10 = vsyncpa [#allocation3], 0 }
   0x3   :  { %12 = vsyncpa [#allocation3 + $0x1], 0 }
   0x4   :  { %13 = vsyncpa [#allocation6], 0 }
   0x5   :  { %15 = vsyncpa [#allocation6 + $0x1], 0 }
   0x6   :  { %16 = vsyncpa [#allocation4], 0 }
   0x7   :  { %18 = vsyncpa [#allocation4 + $0x1], 0  ;;  %s744_s18 = smov 0   ;;  %s746_s19 = smov 0  }
   0x8   :  { %s748_s20 = smov 0   ;;  %s750_s21 = smov 0  }
   0x9 LB: > { %928 = sst [smem:[#allocation13_spill]] %s706_s20  ;;  %s765_s22 = sadd.s32 4294967295, %s710_s21   ;;  %s710_s21 = sphi %s750_s21, %s938_s21   ;;  %s706_s20 = sphi %s748_s20, %s940_s20   ;;  %s702_s19 = sphi %s746_s19, %s942_s19   ;;  %s698_s18 = sphi %s744_s18, %s941_s18  }
   0xa   : > { %s460_s23 = sadd.s32 4294967294, %s710_s21   ;;  %p44_p0 = scmp.ne.s32.totalorder %s702_s19, %s698_s18 }
   0xb   : > { %p45_p1 = scmp.eq.s32.totalorder %s765_s22, 0  ;;  %p157_p2 = scmp.eq.s32.totalorder %s765_s22, 1 }
   0xc   : > { %p163_p3 = scmp.eq.s32.totalorder %s460_s23, 1  ;;  %p461_p5 = scmp.ge.s32.totalorder %s710_s21, 1 }
   0xd   : > { %p774_p4 = por %p45_p1, %p44_p0  ;;  %p170_p7 = scmp.lt.s32.totalorder %s710_s21, 3 }
   0xe   : > { %p779_p6 = por %p163_p3, %p44_p0  ;;  %s931_s2 = sld [smem:[#allocation16_spill]] }
   0xf   : > { %p787_p8 = pnand %p461_p5, %p170_p7  ;;  %s712_s30 = smov [#allocation7]  }
  0x10   : > { %s184_s6 = sshll.u32 %s712_s30, 4  ;;  %s797_s7 = sadd.s32 1, %s710_s21   ;;  %s185_s6 = int_to_ptr.vmem [resolvable:$true] %s184_s6 }
  0x11   : > { %p487_p10 = pneg %p787_p8  ;;  %933 = sst [smem:[#allocation14_spill]] %s797_s7 }
  0x12   : > { %s31_s8 = sadd.s32 1, %s706_s20  ;;  %s28_s9 = ssub.s32 %s710_s21, %s797_s7 }
  0x13   : > { %p488_p11 = pnand %p487_p10, %p45_p1  ;;  %p29_p12 = scmp.eq.s32.totalorder %s28_s9, 0 }
  0x14   : > { %s182_s28 = sshll.u32 %s931_s2, 4  ;;  %p38_p13 = scmp.ne.s32.totalorder %s706_s20, %s702_s19  ;;  %s183_s28 = int_to_ptr.hbm [resolvable:$true] %s182_s28 }
  0x15   : > { %490 = dma.hbm_to_vmem [thread:$0]  (!%p488_p11), %s183_s28, 64, %s185_s6, [#allocation6]  }
  0x16   : > { %p39_p0 = scmp.eq.s32.totalorder %s710_s21, 0  ;;  %p503_p3 = scmp.lt.s32.totalorder %s710_s21, 2 }
  0x17   : > { %s807_s10 = scalar_select %p29_p12, %s706_s20, %s31_s8  }
  0x18   : > { %p40_p5 = por %p39_p0, %p38_p13  ;;  %p811_p7 = por %p157_p2, %p38_p13 }
  0x19   : > { %934 = sst [smem:[#allocation15_spill]] %s807_s10  ;;  %s201_s12 = sand.u32 1, %s706_s20  }
  0x1a   : > { %s465_s13 = sshll.u32 %s710_s21, 2  ;;  %s464_s14 = sshll.u32 %s201_s12, 2 }
  0x1b   : > { %s209_s17 = scalar_lea.hbm %s918_s0, %s465_s13  ;;  %s205_s26 = scalar_lea.vmem [#allocation2], %s464_s14 }
  0x1c   : > { %s211_s23 = sshll.u32 %s209_s17, 4  ;;  %s213_s27 = sshll.u32 %s205_s26, 4  ;;  %s212_s23 = int_to_ptr.hbm [resolvable:$true] %s211_s23  ;;  %s214_s27 = int_to_ptr.vmem [resolvable:$true] %s213_s27 }
  0x1d   : > { %p822_p10 = pnand %p503_p3, %p40_p5  ;;  %s228_s8 = scalar_lea.hbm %s919_s1, %s465_s13 }
  0x1e   : > { %s220_s9 = sand.u32 1, %s710_s21   ;;  %s202_s2 = scalar_lea.sflag [#allocation3], %s201_s12 }
  0x1f   : > { %s576_s15 = sshra.s32 %s212_s23, 4  ;;  %p580_p11 = pneg %p822_p10  ;;  %s577_s15 = int_to_ptr.hbm [resolvable:$true] %s576_s15 }
  0x20   : > { %s578_s16 = scalar_lea.hbm %s577_s15, 4  ;;  %s583_s10 = scalar_lea.hbm %s918_s0, 8 }
  0x21   : > { %p579_p2 = scmp.ne.s32.totalorder %s577_s15, %s578_s16  ;;  %p584_p0 = scmp.lt.s32.totalorder %s577_s15, %s918_s0 }
  0x22   : > { %p585_p3 = scmp.lt.s32.totalorder %s583_s10, %s578_s16 }
  0x23   : > { %p581_p12 = pnand %p580_p11, %p579_p2 }
  0x24   : > { %p586_p5 = por %p585_p3, %p584_p0 }
  0x25   : > { %p582_p13 = pneg %p581_p12 }
  0x27   : > { %p587_p9 = pnand %p586_p5, %p582_p13 }
  0x29   : > { %590 = shalt.err (!%p587_p9)
}
  0x2a   : > { %494 = dma.hbm_to_vmem [thread:$0]  (!%p822_p10), %s212_s23, 64, %s214_s27, %s202_s2  }
  0x2b   : > { %s230_s12 = sshll.u32 %s228_s8, 4  ;;  %s224_s13 = scalar_lea.vmem [#allocation5], %s464_s14  ;;  %s231_s12 = int_to_ptr.hbm [resolvable:$true] %s230_s12 }
  0x2c   : > { %s232_s20 = sshll.u32 %s224_s13, 4  ;;  %s221_s7 = scalar_lea.sflag [#allocation6], %s220_s9  ;;  %s233_s20 = int_to_ptr.vmem [resolvable:$true] %s232_s20 }
  0x2d   : > { %s606_s17 = sshra.s32 %s231_s12, 4  ;;  %s613_s16 = scalar_lea.hbm %s919_s1, 8  ;;  %s607_s17 = int_to_ptr.hbm [resolvable:$true] %s606_s17 }
  0x2e   : > { %s608_s26 = scalar_lea.hbm %s607_s17, 4  ;;  %p614_p9 = scmp.lt.s32.totalorder %s607_s17, %s919_s1 }
  0x2f   : > { %p609_p2 = scmp.ne.s32.totalorder %s607_s17, %s608_s26  ;;  %p615_p13 = scmp.lt.s32.totalorder %s613_s16, %s608_s26 }
  0x31   : > { %p611_p12 = pnand %p609_p2, %p580_p11  ;;  %p616_p3 = por %p615_p13, %p614_p9 }
  0x33   : > { %p612_p0 = pneg %p611_p12 }
  0x35   : > { %p617_p5 = pnand %p616_p3, %p612_p0 }
  0x37   : > { %620 = shalt.err (!%p617_p5)
}
  0x38   : > { %497 = dma.hbm_to_vmem [thread:$0]  (!%p822_p10), %s231_s12, 64, %s233_s20, %s221_s7  }
  0x39   : > { %241 = sbr.rel (%p787_p8) target bundleno = 346 (0x15a), region = 40  ;;  %s857_s14 = sand.u32 (!%p787_p8), 1, %s702_s19  }
  0x3a   : > { %s860_s23 = sshll.u32 (!%p787_p8), %s857_s14, 2  ;;  %s244_s27 = scalar_lea.sflag (!%p787_p8), [#allocation3], %s857_s14 }
  0x3b   : > { %s247_s8 = scalar_lea.vmem (!%p787_p8), [#allocation2], %s860_s23 }
  0x3e   : > { %681 = dma.done.wait (%p774_p4), %s244_s27, 64  }
  0x3f   : > { %683 = vsyncadd (%p774_p4), %s244_s27, 4294967232  ;;  %s253_s20 = sand.u32 1, %s765_s22   ;;  %s257_s7 = scalar_lea.vmem [#allocation5], %s860_s23 }
  0x40   : > { %s254_s29 = scalar_lea.sflag [#allocation6], %s253_s20 }
  0x41   : > { %685 = dma.done.wait (%p774_p4), %s254_s29, 64  }
  0x42   : > { %687 = vsyncadd (%p774_p4), %s254_s29, 4294967232 }
  0x43   : > { %689 = dma.done.wait (%p45_p1), [#allocation6], 64  }
  0x44   : > { %691 = vsyncadd (%p45_p1), [#allocation6], 4294967232  ;;  %v295_v0 = vld [vmem:[%s247_s8] sm:$0xf]  ;;  %v297_v1 = vld [vmem:[%s257_s7] sm:$0xf] }
  0x45   : > { %v300_v2 = vld [vmem:[#allocation7] sm:$0xf]  ;;  %v296_v3 = vunpack.c.l.bf16 %v295_v0  ;;  %v298_v4 = vunpack.c.l.bf16 %v297_v1  ;;  %v713_v8 = vmov 128.0   ;;  %s474_s24 = sshll.u32 %s765_s22, 2  ;;  %v540_v28 = vld [vmem:[%s921_s3] ss:$0 sm:$0xff] }
  0x46   : > { %v301_v5 = vunpack.c.l.bf16 %v300_v2  ;;  %542 = vrcp.f32 %v713_v8  ;;  %v541_v31 = vld [vmem:[%s922_s4] ss:$0 sm:$0xff]  ;;  %s353_s26 = scalar_lea.hbm %s923_s5, %s474_s24  ;;  %s294_s10 = scalar_lea.vmem [#allocation8], %s860_s23 }
  0x47   : > { %v299_v6 = vadd.f32 %v298_v4, %v296_v3  ;;  %s355_s22 = sshll.u32 %s294_s10, 4  ;;  %s357_s15 = sshll.u32 %s353_s26, 4  ;;  %s356_s22 = int_to_ptr.vmem [resolvable:$true] %s355_s22  ;;  %s358_s15 = int_to_ptr.hbm [resolvable:$true] %s357_s15 }
  0x48   : > { %s343_s16 = scalar_lea.sflag [#allocation4], %s857_s14  ;;  %s650_s30 = sshra.s32 %s358_s15, 4  ;;  %s651_s30 = int_to_ptr.hbm [resolvable:$true] %s650_s30 }
  0x49   : > { %v302_v7 = vadd.f32 %v301_v5, %v299_v6  ;;  %s652_s2 = scalar_lea.hbm %s651_s30, 4  ;;  %s656_s20 = scalar_lea.hbm %s923_s5, 8 }
  0x4a   : > { %p653_p1 = scmp.ne.s32.totalorder %s651_s30, %s652_s2  ;;  %p657_p10 = scmp.lt.s32.totalorder %s651_s30, %s923_s5 }
  0x4b   : > { %305 = vadd.xlane.f32.xlu0 %v302_v7  ;;  %p658_p11 = scmp.lt.s32.totalorder %s656_s20, %s652_s2 }
  0x4c   : > { %v543_v9 = vpop.eup %542  ;;  %p654_p4 = pnand %p653_p1, %p811_p7 }
  0x4d   : > { %v308_v10 = vmul.f32 128.0, %v543_v9  ;;  %vm312_vm0 = vweird.f32 %v543_v9  ;;  %p659_p2 = por %p658_p11, %p657_p10 }
  0x4e   : > { %p655_p8 = pneg %p654_p4 }
  0x4f   : > { %v309_v11 = vsub.f32 1.0, %v308_v10 }
  0x50   : > { %p660_p12 = pnand %p659_p2, %p655_p8 }
  0x51   : > { %v310_v12 = vmul.f32 %v543_v9, %v309_v11 }
  0x53   : > { %v311_v13 = vadd.f32 %v543_v9, %v310_v12 }
  0x55   : > { %v313_v14 = vsel %vm312_vm0, %v543_v9, %v311_v13 }
  0xbe   : > { %v306_v15 = vpop.xlane.xlu0 %305 }
  0xbf   : > { %v314_v16 = vmul.f32 %v313_v14, %v306_v15 }
  0xc1   : > { %v315_v17 = vsub.f32 %v302_v7, %v314_v16 }
  0xc3   : > { %v316_v18 = vmul.f32 %v315_v17, %v315_v17 }
  0xc5   : > { %317 = vadd.xlane.f32.xlu0 %v316_v18 }
 0x138   : > { %v318_v19 = vpop.xlane.xlu0 %317 }
 0x139   : > { %v319_v20 = vmul.f32 %v318_v19, %v313_v14 }
 0x13b   : > { %v320_v21 = vadd.f32 1e-12, %v319_v20 }
 0x13d   : > { %544 = vrsqrt.f32 %v320_v21  ;;  %vm327_vm2 = vweird.f32 %v320_v21 }
 0x143   : > { %v545_v22 = vpop.eup %544 }
 0x144   : > { %v322_v23 = vmul.f32 %v545_v22, %v320_v21  ;;  %vm328_vm1 = vweird.f32 %v545_v22 }
 0x145   : > { %vm329_vm3 = vmor %vm327_vm2, %vm328_vm1 }
 0x146   : > { %v323_v24 = vmul.f32 %v545_v22, %v322_v23 }
 0x148   : > { %v324_v25 = vmul.f32 0.5, %v323_v24 }
 0x14a   : > { %v325_v26 = vsub.f32 1.5, %v324_v25 }
 0x14c   : > { %v326_v27 = vmul.f32 %v545_v22, %v325_v26 }
 0x14e   : > { %v330_v29 = vsel %vm329_vm3, %v545_v22, %v326_v27 }
 0x14f   : > { %v331_v30 = vmul.f32 %v330_v29, %v315_v17 }
 0x151   : > { %v335_v32 = vmul.f32 %v540_v28, %v331_v30 }
 0x153   : > { %v339_v33 = vadd.f32 %v541_v31, %v335_v32 }
 0x155   : > { %v340_v34 = vpack.c.bf16 %v339_v33, %v339_v33 }
 0x157   : > { %341 = vst [vmem:[%s294_s10] sm:$0xf] %v340_v34 }
 0x158   : > { %663 = shalt.err (!%p660_p12)
}
 0x159   : > { %485 = dma.vmem_to_hbm [thread:$0]  (%p811_p7), %s356_s22, 64, %s358_s15, %s343_s16  }
 0x15a PF: > { %s369_s14 = sand.u32 1, %s698_s18   ;;  %p937_p0 = scmp.ge.s32.totalorder %s710_s21, 2 }
 0x15b   : > { %s370_s7 = scalar_lea.sflag [#allocation4], %s369_s14 }
 0x15c   : > { %p499_p9 = pnand %p937_p0, %p779_p6 }
 0x15e   : > { %p500_p13 = pneg %p499_p9 }
 0x160   : > { %693 = dma.done.wait (%p500_p13), %s370_s7, 64  }
 0x161   : > { %695 = vsyncadd (%p500_p13), %s370_s7, 4294967232  ;;  %s938_s21 = sld [smem:[#allocation14_spill]]  ;;  %s941_s18 = smov %s702_s19 }
 0x162   : > { %s939_s24 = sld [smem:[#allocation13_spill]] }
 0x163   : > { %s940_s20 = sld [smem:[#allocation15_spill]] }
 0x167   : > { %p21_p3 = scmp.ge.s32.totalorder %s938_s21, 4  }
 0x168   : > { %s942_s19 = smov %s939_s24 }
 0x169   :  { %23 = sbr.rel (!%p21_p3) target bundleno = 9 (0x9), region = 102 }
 0x16e   :  { %376 = vsyncpa [#allocation3], 1 }
 0x16f   :  { %378 = vsyncpa [#allocation3 + $0x1], 1 }
 0x170   :  { %379 = vsyncpa [#allocation6], 1 }
 0x171   :  { %381 = vsyncpa [#allocation6 + $0x1], 1 }
 0x172   :  { %382 = vsyncpa [#allocation4], 1 }
 0x173   :  { %384 = vsyncpa [#allocation4 + $0x1], 1 }

</bundles_post_ra>
